<compile_context>
chip_gen: v7x
topology: tpu7x:2x2x1
jax: 0.10.0
libtpu: 0.0.40
codegen_flags: <defaults>
</compile_context>

<pallas_src>
import functools

import jax
import jax.numpy as jnp
from jax.experimental import pallas as pl
from jax.experimental.pallas import tpu as pltpu


def _g2l_scores_kernel(vid_iou_ref, vid_con_ref, sent_iou_ref, sent_con_ref,
                       mask_ref, out_iou_ref, out_con_ref, *, scale, eps):
    """Both score passes for one (batch-block, TT-block) tile.

    vid_*_ref : (Bb, C, TTb)   video 2D maps, flattened spatially (TT tile)
    sent_*_ref: (Bb, S, C)     sentence features (resident across TT steps)
    mask_ref  : (1, TTb)       flattened mask2d tile (broadcast over S and Bb)
    out_*_ref : (Bb, S, TTb)
    """
    eps2 = eps * eps
    mask = mask_ref[...]  # (1, TTb) f32

    # ---------------- IoU pass: sigmoid(scale * <sent_n, vid_n>) * mask -----
    vid = vid_iou_ref[...]    # (Bb, C, TTb) f32
    sent = sent_iou_ref[...]  # (Bb, S, C)   f32
    # 1 / max(||.||_2, eps) via rsqrt(max(sumsq, eps^2)) -- matches torch
    # F.normalize / clamp_min(eps) semantics (eps^2 = 1e-24 is a normal f32).
    inv_vnorm = jax.lax.rsqrt(
        jnp.maximum(jnp.sum(vid * vid, axis=1, keepdims=True), eps2))   # (Bb,1,TTb)
    inv_snorm = jax.lax.rsqrt(
        jnp.maximum(jnp.sum(sent * sent, axis=2, keepdims=True), eps2))  # (Bb,S,1)
    # Fold the x`scale` of the sigmoid into the sentence normalization
    # (S*C multiplies instead of S*TT).
    sent_n = sent * (inv_snorm * jnp.float32(scale))
    # Contract over C against the *unnormalized* video map; the per-column
    # normalization commutes with the contraction and is applied afterwards.
    raw = jnp.einsum("bsc,bct->bst", sent_n, vid,
                     preferred_element_type=jnp.float32)                 # (Bb,S,TTb)
    out_iou_ref[...] = (jax.nn.sigmoid(raw * inv_vnorm) * mask).astype(
        out_iou_ref.dtype)

    # ---------------- Contrastive pass: <sent_n, vid_n> * mask --------------
    vid = vid_con_ref[...]
    sent = sent_con_ref[...]
    inv_vnorm = jax.lax.rsqrt(
        jnp.maximum(jnp.sum(vid * vid, axis=1, keepdims=True), eps2))   # (Bb,1,TTb)
    inv_snorm = jax.lax.rsqrt(
        jnp.maximum(jnp.sum(sent * sent, axis=2, keepdims=True), eps2))  # (Bb,S,1)
    sent_n = sent * inv_snorm
    raw = jnp.einsum("bsc,bct->bst", sent_n, vid,
                     preferred_element_type=jnp.float32)
    # Fold the mask into the per-column scale: one (Bb,1,TTb) multiply instead
    # of an extra (Bb,S,TTb) one.
    out_con_ref[...] = (raw * (inv_vnorm * mask)).astype(out_con_ref.dtype)


def _vmem_budgets():
    """(per-step tile budget, vmem_limit cap) tuned per TPU generation."""
    cap = 128 * 1024 * 1024
    try:
        info = pltpu.get_tpu_info()
        cap = int(getattr(info, "vmem_capacity_bytes", cap))
    except Exception:  # pragma: no cover - conservative fallback
        pass
    if cap <= 64 * 1024 * 1024:          # v7x: 64 MiB per TensorCore
        return 10 * 1024 * 1024, 40 * 1024 * 1024
    return 14 * 1024 * 1024, 64 * 1024 * 1024   # v5e / v6e: 128 MiB


def _tt_tile_candidates(TT):
    """TT tile sizes (descending) honoring the (8,128) lane rule."""
    if TT % 128 != 0:
        return [TT]                      # must take the full last dim
    n = TT // 128
    return [128 * k for k in range(n, 0, -1) if n % k == 0]


def _step_bytes(bb, ttb, C, S):
    # single-buffered per-step f32 tile bytes for both passes
    return 4 * (2 * bb * C * ttb + 2 * bb * S * C + 2 * bb * S * ttb + ttb)


def _choose_tiles(B, C, S, TT, step_budget_bytes):
    """Largest (batch-block, TT-block) whose per-step tiles fit the budget."""
    tt_cands = _tt_tile_candidates(TT)
    b_cands = [b for b in range(B, 0, -1) if B % b == 0]
    for ttb in tt_cands:                 # prefer lane-dense full-TT blocks
        for bb in b_cands:
            if _step_bytes(bb, ttb, C, S) <= step_budget_bytes:
                return bb, ttb
    return 1, tt_cands[-1]               # oversized inputs: smallest legal tile


def g2l_forward_eval(map2d, map2d_iou, sent_feat, sent_feat_iou, mask2d, *, scale=10.0):
    """Eval-branch of G2L.forward.

    map2d, map2d_iou: (B, C, T, T) float32  (proposal_conv outputs)
    sent_feat, sent_feat_iou: (B, S, C) float32 (text_encoder outputs,
        fixed num_sent S per batch element)
    mask2d: (T, T) float32 (feat2d.mask2d)

    Returns (map2d_iou, sent_feat_iou, contrastive_scores, iou_scores) with the
    score tensors shaped (B, S, T, T).
    """
    B, C, T, T2 = map2d.shape
    assert T == T2 and map2d_iou.shape == map2d.shape
    S = sent_feat.shape[1]
    TT = T * T

    # Free reshapes (contiguous collapse of the last two dims); no stacking,
    # no extra HBM traffic before the kernel.
    vid_iou = map2d_iou.reshape(B, C, TT).astype(jnp.float32)
    vid_con = map2d.reshape(B, C, TT).astype(jnp.float32)
    s_iou = sent_feat_iou.astype(jnp.float32)
    s_con = sent_feat.astype(jnp.float32)
    mask_flat = mask2d.reshape(1, TT).astype(jnp.float32)

    step_budget, vmem_cap_limit = _vmem_budgets()
    Bb, TTb = _choose_tiles(B, C, S, TT, step_budget)

    # Guarantee >=2 "parallel" grid steps so both v7x TensorCores get work.
    if (B // Bb) * (TT // TTb) < 2:
        if TT % 256 == 0:
            TTb = TT // 2
        elif B % 2 == 0:
            Bb = B // 2
    nb, nt = B // Bb, TT // TTb

    step = _step_bytes(Bb, TTb, C, S)
    vmem_limit = int(min(max(2 * step + (4 << 20), 16 << 20), vmem_cap_limit))

    kernel = functools.partial(_g2l_scores_kernel, scale=float(scale), eps=1e-12)

    # Grid: (batch blocks, TT blocks); TT innermost so the (Bb,S,C) sentence
    # blocks keep the same block index across consecutive steps (no re-DMA).
    out_iou, out_con = pl.pallas_call(
        kernel,
        out_shape=(
            jax.ShapeDtypeStruct((B, S, TT), jnp.float32),
            jax.ShapeDtypeStruct((B, S, TT), jnp.float32),
        ),
        grid=(nb, nt),
        in_specs=[
            pl.BlockSpec((Bb, C, TTb), lambda b, t: (b, 0, t)),   # vid_iou
            pl.BlockSpec((Bb, C, TTb), lambda b, t: (b, 0, t)),   # vid_con
            pl.BlockSpec((Bb, S, C), lambda b, t: (b, 0, 0)),     # sent_iou
            pl.BlockSpec((Bb, S, C), lambda b, t: (b, 0, 0)),     # sent_con
            pl.BlockSpec((1, TTb), lambda b, t: (0, t)),          # mask
        ],
        out_specs=(
            pl.BlockSpec((Bb, S, TTb), lambda b, t: (b, 0, t)),
            pl.BlockSpec((Bb, S, TTb), lambda b, t: (b, 0, t)),
        ),
        compiler_params=pltpu.CompilerParams(
            dimension_semantics=("parallel", "parallel"),
            vmem_limit_bytes=vmem_limit,
        ),
    )(vid_iou, vid_con, s_iou, s_con, mask_flat)

    iou_scores = out_iou.reshape(B, S, T, T)
    contrastive_scores = out_con.reshape(B, S, T, T)
    return map2d_iou, sent_feat_iou, contrastive_scores, iou_scores


def _reference_scores(map2d, sent_feat, mask2d, scale=10.0, apply_sigmoid=False):
    """Plain-JAX reference reproducing the PyTorch semantics verbatim."""
    eps = 1e-12
    B, C, T, _ = map2d.shape
    outs = []
    for i in range(B):
        vid = map2d[i]                                               # (C, T, T)
        vnorm = jnp.sqrt(jnp.sum(vid * vid, axis=0, keepdims=True))
        vid_n = vid / jnp.maximum(vnorm, eps)
        sf = sent_feat[i]                                            # (S, C)
        snorm = jnp.sqrt(jnp.sum(sf * sf, axis=1, keepdims=True))
        sf_n = sf / jnp.maximum(snorm, eps)
        sc = (sf_n @ vid_n.reshape(C, T * T)).reshape(-1, T, T)
        if apply_sigmoid:
            sc = jax.nn.sigmoid(sc * scale)
        outs.append(sc * mask2d)
    return jnp.stack(outs, axis=0)


if __name__ == "__main__":
    key = jax.random.PRNGKey(0)
    B, C, T, S = 2, 32, 16, 8   # batch, joint-space channels, clip length, num_sent

    k1, k2, k3, k4 = jax.random.split(key, 4)
    # Synthetic stand-ins for proposal_conv / text_encoder outputs.
    map2d = jax.random.normal(k1, (B, C, T, T), dtype=jnp.float32)
    map2d_iou = jax.random.normal(k2, (B, C, T, T), dtype=jnp.float32)
    sent_feat = jax.random.normal(k3, (B, S, C), dtype=jnp.float32)
    sent_feat_iou = jax.random.normal(k4, (B, S, C), dtype=jnp.float32)
    # feat2d.mask2d: valid (start <= end) upper-triangular proposal mask.
    mask2d = jnp.triu(jnp.ones((T, T), dtype=jnp.float32))

    m2d_iou, sf_iou, contrastive_scores, iou_scores = jax.jit(g2l_forward_eval)(
        map2d, map2d_iou, sent_feat, sent_feat_iou, mask2d
    )
    jax.block_until_ready((contrastive_scores, iou_scores))

    # Correctness check against a plain-JAX reference of the PyTorch math.
    # Tolerance slightly relaxed vs 1e-5 because the kernel uses rsqrt and
    # post-matmul normalization (numerically equivalent reassociation).
    ref_iou = _reference_scores(map2d_iou, sent_feat_iou, mask2d,
                                scale=10.0, apply_sigmoid=True)
    ref_con = _reference_scores(map2d, sent_feat, mask2d, apply_sigmoid=False)
    assert jnp.allclose(iou_scores, ref_iou, atol=1e-4, rtol=1e-4)
    assert jnp.allclose(contrastive_scores, ref_con, atol=1e-4, rtol=1e-4)

    print("KERNEL_OK")
</pallas_src>

<mosaic_0001>
module attributes {stable_mosaic.version = 11 : i64} {
  func.func @_g2l_scores_kernel(%arg0: i32, %arg1: i32, %arg2: memref<2x32x128xf32, #tpu.memory_space<vmem>>, %arg3: memref<2x32x128xf32, #tpu.memory_space<vmem>>, %arg4: memref<2x8x32xf32, #tpu.memory_space<vmem>>, %arg5: memref<2x8x32xf32, #tpu.memory_space<vmem>>, %arg6: memref<1x128xf32, #tpu.memory_space<vmem>>, %arg7: memref<2x8x128xf32, #tpu.memory_space<vmem>>, %arg8: memref<2x8x128xf32, #tpu.memory_space<vmem>>) attributes {dimension_semantics = [#tpu.dimension_semantics<parallel>, #tpu.dimension_semantics<parallel>], iteration_bounds = array<i64: 1, 2>, scalar_prefetch = 0 : i64, scratch_operands = 0 : i64, tpu.core_type = #tpu.core_type<tc>, window_params = [{transform_indices = @transform_0, window_bounds = array<i64: 2, 32, 128>}, {transform_indices = @transform_1, window_bounds = array<i64: 2, 32, 128>}, {transform_indices = @transform_2, window_bounds = array<i64: 2, 8, 32>}, {transform_indices = @transform_3, window_bounds = array<i64: 2, 8, 32>}, {transform_indices = @transform_4, window_bounds = array<i64: 1, 128>}, {transform_indices = @transform_5, window_bounds = array<i64: 2, 8, 128>}, {transform_indices = @transform_6, window_bounds = array<i64: 2, 8, 128>}]} {
    %c0 = arith.constant 0 : index
    %c0_0 = arith.constant 0 : index
    %0 = vector.load %arg6[%c0, %c0_0] : memref<1x128xf32, #tpu.memory_space<vmem>>, vector<1x128xf32>
    %c0_1 = arith.constant 0 : index
    %c0_2 = arith.constant 0 : index
    %c0_3 = arith.constant 0 : index
    %1 = vector.load %arg2[%c0_1, %c0_2, %c0_3] : memref<2x32x128xf32, #tpu.memory_space<vmem>>, vector<2x32x128xf32>
    %c0_4 = arith.constant 0 : index
    %c0_5 = arith.constant 0 : index
    %c0_6 = arith.constant 0 : index
    %2 = vector.load %arg4[%c0_4, %c0_5, %c0_6] : memref<2x8x32xf32, #tpu.memory_space<vmem>>, vector<2x8x32xf32>
    %3 = arith.mulf %1, %1 : vector<2x32x128xf32>
    %cst = arith.constant dense<0.000000e+00> : vector<2x128xf32>
    %4 = vector.multi_reduction <add>, %3, %cst [1] : vector<2x32x128xf32> to vector<2x128xf32>
    %5 = vector.shape_cast %4 : vector<2x128xf32> to vector<2x1x128xf32>
    %cst_7 = arith.constant 1.000000e-24 : f32
    %6 = vector.broadcast %cst_7 : f32 to vector<2x1x128xf32>
    %7 = arith.maximumf %5, %6 : vector<2x1x128xf32>
    %8 = math.rsqrt %7 : vector<2x1x128xf32>
    %9 = arith.mulf %2, %2 : vector<2x8x32xf32>
    %cst_8 = arith.constant dense<0.000000e+00> : vector<2x8xf32>
    %10 = vector.multi_reduction <add>, %9, %cst_8 [2] : vector<2x8x32xf32> to vector<2x8xf32>
    %11 = vector.shape_cast %10 : vector<2x8xf32> to vector<2x8x1xf32>
    %cst_9 = arith.constant 1.000000e-24 : f32
    %12 = vector.broadcast %cst_9 : f32 to vector<2x8x1xf32>
    %13 = arith.maximumf %11, %12 : vector<2x8x1xf32>
    %14 = math.rsqrt %13 : vector<2x8x1xf32>
    %cst_10 = arith.constant 1.000000e+01 : f32
    %15 = vector.broadcast %cst_10 : f32 to vector<2x8x1xf32>
    %16 = arith.mulf %14, %15 : vector<2x8x1xf32>
    %17 = vector.broadcast %16 : vector<2x8x1xf32> to vector<2x8x32xf32>
    %18 = arith.mulf %2, %17 : vector<2x8x32xf32>
    "tpu.trace_start"() <{level = 10 : i32, message = "bsc,bct->bst"}> : () -> ()
    %cst_11 = arith.constant dense<0.000000e+00> : vector<2x8x128xf32>
    %19 = tpu.matmul %18, %1, %cst_11 {dimension_numbers = #tpu.dot_dimension_numbers<[2], [1], [1], [2], [0, 0, 0, 1, 1, 2], [0], [0]>} : vector<2x8x32xf32>, vector<2x32x128xf32>, vector<2x8x128xf32> -> vector<2x8x128xf32>
    "tpu.trace_stop"() : () -> ()
    %20 = vector.broadcast %8 : vector<2x1x128xf32> to vector<2x8x128xf32>
    %21 = arith.mulf %19, %20 : vector<2x8x128xf32>
    %22 = arith.negf %21 : vector<2x8x128xf32>
    %23 = math.exp %22 : vector<2x8x128xf32>
    %cst_12 = arith.constant 1.000000e+00 : f32
    %24 = vector.broadcast %cst_12 : f32 to vector<2x8x128xf32>
    %25 = arith.addf %24, %23 : vector<2x8x128xf32>
    %26 = arith.divf %24, %25 : vector<2x8x128xf32>
    %27 = vector.shape_cast %0 : vector<1x128xf32> to vector<1x1x128xf32>
    %28 = vector.broadcast %27 : vector<1x1x128xf32> to vector<2x8x128xf32>
    %29 = arith.mulf %26, %28 : vector<2x8x128xf32>
    %c0_13 = arith.constant 0 : index
    %c0_14 = arith.constant 0 : index
    %c0_15 = arith.constant 0 : index
    %30 = vector.load %arg7[%c0_13, %c0_14, %c0_15] : memref<2x8x128xf32, #tpu.memory_space<vmem>>, vector<2x8x128xf32>
    tpu.vector_store %arg7[%c0_13, %c0_14, %c0_15], %29 {strides = array<i32>} : memref<2x8x128xf32, #tpu.memory_space<vmem>>, vector<2x8x128xf32>,
    %c0_16 = arith.constant 0 : index
    %c0_17 = arith.constant 0 : index
    %c0_18 = arith.constant 0 : index
    %31 = vector.load %arg3[%c0_16, %c0_17, %c0_18] : memref<2x32x128xf32, #tpu.memory_space<vmem>>, vector<2x32x128xf32>
    %c0_19 = arith.constant 0 : index
    %c0_20 = arith.constant 0 : index
    %c0_21 = arith.constant 0 : index
    %32 = vector.load %arg5[%c0_19, %c0_20, %c0_21] : memref<2x8x32xf32, #tpu.memory_space<vmem>>, vector<2x8x32xf32>
    %33 = arith.mulf %31, %31 : vector<2x32x128xf32>
    %cst_22 = arith.constant dense<0.000000e+00> : vector<2x128xf32>
    %34 = vector.multi_reduction <add>, %33, %cst_22 [1] : vector<2x32x128xf32> to vector<2x128xf32>
    %35 = vector.shape_cast %34 : vector<2x128xf32> to vector<2x1x128xf32>
    %cst_23 = arith.constant 1.000000e-24 : f32
    %36 = vector.broadcast %cst_23 : f32 to vector<2x1x128xf32>
    %37 = arith.maximumf %35, %36 : vector<2x1x128xf32>
    %38 = math.rsqrt %37 : vector<2x1x128xf32>
    %39 = arith.mulf %32, %32 : vector<2x8x32xf32>
    %cst_24 = arith.constant dense<0.000000e+00> : vector<2x8xf32>
    %40 = vector.multi_reduction <add>, %39, %cst_24 [2] : vector<2x8x32xf32> to vector<2x8xf32>
    %41 = vector.shape_cast %40 : vector<2x8xf32> to vector<2x8x1xf32>
    %cst_25 = arith.constant 1.000000e-24 : f32
    %42 = vector.broadcast %cst_25 : f32 to vector<2x8x1xf32>
    %43 = arith.maximumf %41, %42 : vector<2x8x1xf32>
    %44 = math.rsqrt %43 : vector<2x8x1xf32>
    %45 = vector.broadcast %44 : vector<2x8x1xf32> to vector<2x8x32xf32>
    %46 = arith.mulf %32, %45 : vector<2x8x32xf32>
    "tpu.trace_start"() <{level = 10 : i32, message = "bsc,bct->bst"}> : () -> ()
    %cst_26 = arith.constant dense<0.000000e+00> : vector<2x8x128xf32>
    %47 = tpu.matmul %46, %31, %cst_26 {dimension_numbers = #tpu.dot_dimension_numbers<[2], [1], [1], [2], [0, 0, 0, 1, 1, 2], [0], [0]>} : vector<2x8x32xf32>, vector<2x32x128xf32>, vector<2x8x128xf32> -> vector<2x8x128xf32>
    "tpu.trace_stop"() : () -> ()
    %48 = vector.shape_cast %0 : vector<1x128xf32> to vector<1x1x128xf32>
    %49 = vector.broadcast %48 : vector<1x1x128xf32> to vector<2x1x128xf32>
    %50 = arith.mulf %38, %49 : vector<2x1x128xf32>
    %51 = vector.broadcast %50 : vector<2x1x128xf32> to vector<2x8x128xf32>
    %52 = arith.mulf %47, %51 : vector<2x8x128xf32>
    %c0_27 = arith.constant 0 : index
    %c0_28 = arith.constant 0 : index
    %c0_29 = arith.constant 0 : index
    %53 = vector.load %arg8[%c0_27, %c0_28, %c0_29] : memref<2x8x128xf32, #tpu.memory_space<vmem>>, vector<2x8x128xf32>
    tpu.vector_store %arg8[%c0_27, %c0_28, %c0_29], %52 {strides = array<i32>} : memref<2x8x128xf32, #tpu.memory_space<vmem>>, vector<2x8x128xf32>,
    return
  }
  func.func @transform_0(%arg0: i32, %arg1: i32) -> (i32, i32, i32) {
    %c0_i32 = arith.constant 0 : i32
    %c0_i32_0 = arith.constant 0 : i32
    return %arg0, %c0_i32, %arg1 : i32, i32, i32
  }
  func.func @transform_1(%arg0: i32, %arg1: i32) -> (i32, i32, i32) {
    %c0_i32 = arith.constant 0 : i32
    %c0_i32_0 = arith.constant 0 : i32
    return %arg0, %c0_i32, %arg1 : i32, i32, i32
  }
  func.func @transform_2(%arg0: i32, %arg1: i32) -> (i32, i32, i32) {
    %c0_i32 = arith.constant 0 : i32
    %c0_i32_0 = arith.constant 0 : i32
    %c0_i32_1 = arith.constant 0 : i32
    return %arg0, %c0_i32, %c0_i32_0 : i32, i32, i32
  }
  func.func @transform_3(%arg0: i32, %arg1: i32) -> (i32, i32, i32) {
    %c0_i32 = arith.constant 0 : i32
    %c0_i32_0 = arith.constant 0 : i32
    %c0_i32_1 = arith.constant 0 : i32
    return %arg0, %c0_i32, %c0_i32_0 : i32, i32, i32
  }
  func.func @transform_4(%arg0: i32, %arg1: i32) -> (i32, i32) {
    %c0_i32 = arith.constant 0 : i32
    %c0_i32_0 = arith.constant 0 : i32
    return %c0_i32, %arg1 : i32, i32
  }
  func.func @transform_5(%arg0: i32, %arg1: i32) -> (i32, i32, i32) {
    %c0_i32 = arith.constant 0 : i32
    %c0_i32_0 = arith.constant 0 : i32
    return %arg0, %c0_i32, %arg1 : i32, i32, i32
  }
  func.func @transform_6(%arg0: i32, %arg1: i32) -> (i32, i32, i32) {
    %c0_i32 = arith.constant 0 : i32
    %c0_i32_0 = arith.constant 0 : i32
    return %arg0, %c0_i32, %arg1 : i32, i32, i32
  }
}

</mosaic_0001>

<bundles_post_ra>
// kernel: g2l_forward_eval.1
= control target key start
LH: loop header
LB: loop body
LE: loop exit
PB: predicated region body
PF: predicated region fallthrough
CT: control target
= control target key end

     0   :  { %s1441_s21 = smov 0   ;;  %s1443_s22 = smov 0   ;;  %s1607_s0 = inlined_call_operand.vmem [shape: f32[2,32,256], index: 0, kind: input, shape index: {}]   ;;  %s1608_s1 = inlined_call_operand.vmem [shape: f32[2,32,256], index: 1, kind: input, shape index: {}]   ;;  %s1609_s2 = inlined_call_operand.vmem [shape: f32[2,8,32], index: 2, kind: input, shape index: {}]   ;;  %s1610_s3 = inlined_call_operand.vmem [shape: f32[2,8,32], index: 3, kind: input, shape index: {}]   ;;  %s1611_s4 = inlined_call_operand.vmem [shape: f32[1,256], index: 4, kind: input, shape index: {}]   ;;  %s1612_s5 = inlined_call_operand.vmem [shape: f32[2,8,256], index: 5, kind: output, shape index: {0}]   ;;  %s1613_s6 = inlined_call_operand.vmem [shape: f32[2,8,256], index: 6, kind: output, shape index: {1}]  }
   0x1   :  { %s1445_s23 = smov 0   ;;  %s1447_s24 = smov 0  }
   0x2   :  { %s1449_s25 = smov 0  }
   0x3 LB: > { %s26_s26 = sadd.s32 1, %s1397_s24  ;;  %s1181_s27 = sadd.s32 4294967295, %s1401_s25   ;;  %s1401_s25 = sphi %s1449_s25, %s17_s25   ;;  %s1397_s24 = sphi %s1447_s24, %s1619_s24   ;;  %s1393_s23 = sphi %s1445_s23, %s1618_s23   ;;  %s1389_s22 = sphi %s1443_s22, %s1617_s22   ;;  %s1385_s21 = sphi %s1441_s21, %s1616_s21  }
   0x4   : > { %p27_p0 = scmp.ge.s32.totalorder %s26_s26, 2  ;;  %p45_p1 = scmp.ne.s32.totalorder %s1389_s22, %s1385_s21 }
   0x5   : > { %p46_p2 = scmp.eq.s32.totalorder %s1401_s25, 0  ;;  %p183_p4 = scmp.eq.s32.totalorder %s1181_s27, 1 }
   0x6   : > { %s1621_s26 = smov (%p27_p0, %s26_s26), 0  ;;  %s38_s30 = sadd.s32 1, %s1389_s22 }
   0x7   : > { %p1473_p3 = por %p46_p2, %p45_p1  ;;  %s34_s29 = ssub.s32 %s1397_s24, %s1621_s26 }
   0x8   : > { %p36_p5 = scmp.eq.s32.totalorder %s34_s29, 0  ;;  %p1480_p6 = por %p183_p4, %p45_p1 }
   0x9   : > { %p1186_p7 = scmp.ge.s32.totalorder %s1401_s25, 2 }
   0xa   : > { %s1485_s8 = scalar_select %p36_p5, %s1389_s22, %s38_s30  }
   0xb   : > { %251 = sbr.rel (%p1186_p7) target bundleno = 34 (0x22), region = 24 }
  0x12   : > { %254 = sbr.rel (!%p1473_p3) target bundleno = 26 (0x1a), region = 28  ;;  %s256_s9 = sand.u32 (%p1473_p3), 1, %s1389_s22  }
  0x13   : > { %s1188_s10 = sshll.u32 (%p1473_p3), %s1397_s24, 3  ;;  %s1187_s11 = sshll.u32 (%p1473_p3), %s256_s9, 6 }
  0x14   : > { %s263_s14 = scalar_lea.vmem (%p1473_p3), %s1607_s0, %s1188_s10  ;;  %s258_s15 = scalar_lea.vmem (%p1473_p3), [#allocation2], %s1187_s11 }
  0x15   : > { %v305_v0 = vld [vmem:[%s263_s14] sm:$0xff] (%p1473_p3)  ;;  %v307_v1 = vld [vmem:[%s263_s14 + $0x10] sm:$0xff] (%p1473_p3) }
  0x16   : > { %v309_v2 = vld [vmem:[%s263_s14 + $0x20] sm:$0xff] (%p1473_p3)  ;;  %306 = vst [vmem:[%s258_s15] sm:$0xff] (%p1473_p3), %v305_v0  ;;  %308 = vst [vmem:[%s258_s15 + $0x8] sm:$0xff] (%p1473_p3), %v307_v1  ;;  %v311_v3 = vld [vmem:[%s263_s14 + $0x30] sm:$0xff] (%p1473_p3) }
  0x17   : > { %310 = vst [vmem:[%s258_s15 + $0x10] sm:$0xff] (%p1473_p3), %v309_v2  ;;  %v313_v4 = vld [vmem:[%s263_s14 + $0x40] sm:$0xff] (%p1473_p3)  ;;  %v315_v5 = vld [vmem:[%s263_s14 + $0x50] sm:$0xff] (%p1473_p3)  ;;  %312 = vst [vmem:[%s258_s15 + $0x18] sm:$0xff] (%p1473_p3), %v311_v3 }
  0x18   : > { %314 = vst [vmem:[%s258_s15 + $0x20] sm:$0xff] (%p1473_p3), %v313_v4  ;;  %316 = vst [vmem:[%s258_s15 + $0x28] sm:$0xff] (%p1473_p3), %v315_v5  ;;  %v317_v6 = vld [vmem:[%s263_s14 + $0x60] sm:$0xff] (%p1473_p3)  ;;  %v319_v7 = vld [vmem:[%s263_s14 + $0x70] sm:$0xff] (%p1473_p3) }
  0x19   : > { %318 = vst [vmem:[%s258_s15 + $0x30] sm:$0xff] %v317_v6  ;;  %320 = vst [vmem:[%s258_s15 + $0x38] sm:$0xff] %v319_v7 }
  0x1a PF: > { %326 = sbr.rel (!%p1473_p3) target bundleno = 34 (0x22), region = 66  ;;  %s328_s16 = sand.u32 (%p1473_p3), 1, %s1389_s22  }
  0x1b   : > { %s1190_s17 = sshll.u32 (%p1473_p3), %s1397_s24, 3  ;;  %s1189_s18 = sshll.u32 (%p1473_p3), %s328_s16, 6 }
  0x1c   : > { %s335_s27 = scalar_lea.vmem (%p1473_p3), %s1608_s1, %s1190_s17  ;;  %s330_s29 = scalar_lea.vmem (%p1473_p3), [#allocation3], %s1189_s18 }
  0x1d   : > { %v377_v8 = vld [vmem:[%s335_s27] sm:$0xff] (%p1473_p3)  ;;  %v379_v9 = vld [vmem:[%s335_s27 + $0x10] sm:$0xff] (%p1473_p3) }
  0x1e   : > { %v381_v10 = vld [vmem:[%s335_s27 + $0x20] sm:$0xff] (%p1473_p3)  ;;  %378 = vst [vmem:[%s330_s29] sm:$0xff] (%p1473_p3), %v377_v8  ;;  %380 = vst [vmem:[%s330_s29 + $0x8] sm:$0xff] (%p1473_p3), %v379_v9  ;;  %v383_v11 = vld [vmem:[%s335_s27 + $0x30] sm:$0xff] (%p1473_p3) }
  0x1f   : > { %382 = vst [vmem:[%s330_s29 + $0x10] sm:$0xff] (%p1473_p3), %v381_v10  ;;  %v385_v12 = vld [vmem:[%s335_s27 + $0x40] sm:$0xff] (%p1473_p3)  ;;  %v387_v13 = vld [vmem:[%s335_s27 + $0x50] sm:$0xff] (%p1473_p3)  ;;  %384 = vst [vmem:[%s330_s29 + $0x18] sm:$0xff] (%p1473_p3), %v383_v11 }
  0x20   : > { %386 = vst [vmem:[%s330_s29 + $0x20] sm:$0xff] (%p1473_p3), %v385_v12  ;;  %388 = vst [vmem:[%s330_s29 + $0x28] sm:$0xff] (%p1473_p3), %v387_v13  ;;  %v389_v14 = vld [vmem:[%s335_s27 + $0x60] sm:$0xff] (%p1473_p3)  ;;  %v391_v15 = vld [vmem:[%s335_s27 + $0x70] sm:$0xff] (%p1473_p3) }
  0x21   : > { %390 = vst [vmem:[%s330_s29 + $0x30] sm:$0xff] %v389_v14  ;;  %392 = vst [vmem:[%s330_s29 + $0x38] sm:$0xff] %v391_v15 }
  0x22 PF: > { %p1191_p8 = scmp.ge.s32.totalorder %s1401_s25, 1  ;;  %p403_p9 = scmp.lt.s32.totalorder %s1401_s25, 3 }
  0x24   : > { %p404_p10 = pnand %p1191_p8, %p403_p9 }
  0x25   : > { %v1507_v16 = vld [vmem:[%s1609_s2] sm:$0xff] (!%p404_p10)  ;;  %vm528_vm0 = vcmask (!%p404_p10), 261120   ;;  %v1512_v17 = vld [vmem:[%s1609_s2 + $0x8] sm:$0xff] (!%p404_p10)  ;;  %s410_s15 = sand.u32 (!%p404_p10), 1, %s1385_s21   ;;  %v1403_v31 = vmov (!%p404_p10), 0.0|0.0   ;;  %vm1404_vm1 = vmmov (!%p404_p10), 0  }
  0x26   : > { %407 = sbr.rel (%p404_p10) target bundleno = 462 (0x1ce), region = 108  ;;  %v1517_v18 = vld [vmem:[%s1610_s3] sm:$0xff] (!%p404_p10)  ;;  %v526_v19 = vmul.f32 (!%p404_p10), %v1507_v16, %v1507_v16  ;;  %v527_v20 = vmul.f32 (!%p404_p10), %v1512_v17, %v1512_v17  ;;  %v1528_v22 = vld [vmem:[%s1610_s3 + $0x8] sm:$0xff] (!%p404_p10)  ;;  %s1539_s16 = sshll.u32 (!%p404_p10), %s410_s15, 6  ;;  %1272 = vmatprep.subr.bf16.mxu0 (!%p404_p10), %v1403_v31  ;;  %1278 = vmatprep.subr.bf16.mxu1 (!%p404_p10), %v1403_v31  ;;  %v1405_v40 = vmov (!%p404_p10), 0.0  }
  0x27   : > { %v753_v21 = vmul.f32 (!%p404_p10), %v1517_v18, %v1517_v18  ;;  %v754_v23 = vmul.f32 (!%p404_p10), %v1528_v22, %v1528_v22  ;;  %s412_s17 = scalar_lea.vmem (!%p404_p10), [#allocation2], %s1539_s16  ;;  %1236 = vmatprep.mubr.msk.f32.mxu0 (!%p404_p10), %vm1404_vm1, %v1405_v40  ;;  %1247 = vmatprep.mubr.msk.f32.mxu1 (!%p404_p10), %vm1404_vm1, %v1405_v40  ;;  %s419_s18 = scalar_lea.vmem (!%p404_p10), [#allocation3], %s1539_s16 }
  0x28   : > { %v529_v24 = vsel (!%p404_p10), %vm528_vm0, %v526_v19, 0.0  ;;  %v532_v26 = vsel (!%p404_p10), %vm528_vm0, %v527_v20, 0.0  ;;  %v486_v28 = vld [vmem:[%s412_s17] sm:$0xff] (!%p404_p10)  ;;  %v487_v29 = vld [vmem:[%s412_s17 + $0x8] sm:$0xff] (!%p404_p10)  ;;  %v488_v32 = vld [vmem:[%s412_s17 + $0x10] sm:$0xff] (!%p404_p10)  ;;  %p480_p11 = scmp.lt.s32.totalorder (!%p404_p10), %s1393_s23, 1 }
  0x29   : > { %v755_v25 = vsel (!%p404_p10), %vm528_vm0, %v753_v21, 0.0  ;;  %530 = vadd.xlane.f32.xlu0 (!%p404_p10), %v529_v24  ;;  %v758_v27 = vsel (!%p404_p10), %vm528_vm0, %v754_v23, 0.0  ;;  %v1273_v30 = vpack.c.bf16 (!%p404_p10), %v487_v29, %v486_v28  ;;  %v489_v33 = vld [vmem:[%s412_s17 + $0x18] sm:$0xff] (!%p404_p10)  ;;  %v490_v34 = vld [vmem:[%s412_s17 + $0x20] sm:$0xff] (!%p404_p10)  ;;  %v491_v36 = vld [vmem:[%s412_s17 + $0x28] sm:$0xff] (!%p404_p10)  ;;  %v496_v42 = vmul.f32 (!%p404_p10), %v486_v28, %v486_v28  ;;  %s1194_s28 = sshll.u32 (!%p404_p10), %s410_s15, 4 }
  0x2a   : > { %756 = vadd.xlane.f32.xlu1 (!%p404_p10), %v755_v25  ;;  %v1276_v35 = vpack.c.bf16 (!%p404_p10), %v489_v33, %v488_v32  ;;  %v1279_v37 = vpack.c.bf16 (!%p404_p10), %v491_v36, %v490_v34  ;;  %v492_v38 = vld [vmem:[%s412_s17 + $0x30] sm:$0xff] (!%p404_p10)  ;;  %v493_v39 = vld [vmem:[%s412_s17 + $0x38] sm:$0xff] (!%p404_p10)  ;;  %v497_v43 = vmul.f32 (!%p404_p10), %v487_v29, %v487_v29  ;;  %v498_v44 = vmul.f32 (!%p404_p10), %v488_v32, %v488_v32  ;;  %v713_v50 = vld [vmem:[%s419_s18] sm:$0xff] (!%p404_p10)  ;;  %s1574_s30 = scalar_lea.vmem (!%p404_p10), [#allocation5], %s1194_s28  ;;  %s459_s21 = scalar_lea.vmem (!%p404_p10), [#allocation4], %s1194_s28 }
  0x2b   : > { %1274 = vmatpush3.bf16.msra.mxu0 (!%p404_p10), %v1273_v30  ;;  %v1282_v41 = vpack.c.bf16 (!%p404_p10), %v493_v39, %v492_v38  ;;  %v500_v45 = vmul.f32 (!%p404_p10), %v490_v34, %v490_v34  ;;  %v501_v46 = vmul.f32 (!%p404_p10), %v491_v36, %v491_v36  ;;  %v502_v47 = vmul.f32 (!%p404_p10), %v492_v38, %v492_v38  ;;  %v714_v51 = vld [vmem:[%s419_s18 + $0x8] sm:$0xff] (!%p404_p10)  ;;  %v715_v56 = vld [vmem:[%s419_s18 + $0x10] sm:$0xff] (!%p404_p10)  ;;  %v716_v57 = vld [vmem:[%s419_s18 + $0x18] sm:$0xff] (!%p404_p10) }
  0x2c   : > { %1275 = vmatprep.subr.bf16.mxu0 (!%p404_p10), %v1403_v31  ;;  %1280 = vmatpush3.bf16.msra.mxu1 (!%p404_p10), %v1279_v37  ;;  %v504_v48 = vadd.f32 (!%p404_p10), %v497_v43, %v496_v42  ;;  %v499_v49 = vmul.f32 (!%p404_p10), %v489_v33, %v489_v33  ;;  %v503_v53 = vmul.f32 (!%p404_p10), %v493_v39, %v493_v39  ;;  %v717_v61 = vld [vmem:[%s419_s18 + $0x20] sm:$0xff] (!%p404_p10)  ;;  %v718_v62 = vld [vmem:[%s419_s18 + $0x28] sm:$0xff] (!%p404_p10)  ;;  %v719_v4 = vld [vmem:[%s419_s18 + $0x30] sm:$0xff] (!%p404_p10) }
  0x2d   : > { %533 = vadd.xlane.f32.xlu0 %v532_v26  ;;  %1281 = vmatprep.subr.bf16.mxu1 %v1403_v31  ;;  %v513_v52 = vadd.f32 %v501_v46, %v500_v45  ;;  %v723_v54 = vmul.f32 %v713_v50, %v713_v50  ;;  %v724_v55 = vmul.f32 %v714_v51, %v714_v51  ;;  %v720_v8 = vld [vmem:[%s419_s18 + $0x38] sm:$0xff]  ;;  %s481_s19 = scalar_select %p480_p11, %s1393_s23, 1 }
  0x2e   : > { %759 = vadd.xlane.f32.xlu1 %v758_v27  ;;  %v505_v58 = vadd.f32 %v504_v48, %v498_v44  ;;  %v725_v59 = vmul.f32 %v715_v56, %v715_v56  ;;  %v726_v60 = vmul.f32 %v716_v57, %v716_v57  ;;  %v727_v1 = vmul.f32 %v717_v61, %v717_v61  ;;  %s1204_s9 = sshll.u32 (%p1480_p6), %s1393_s23, 3 }
  0x2f   : > { %1277 = vmatpush3.bf16.msra.mxu0 %v1276_v35  ;;  %v514_v63 = vadd.f32 %v513_v52, %v502_v47  ;;  %v731_v0 = vadd.f32 %v724_v55, %v723_v54  ;;  %v728_v2 = vmul.f32 %v718_v62, %v718_v62  ;;  %v729_v9 = vmul.f32 %v719_v4, %v719_v4  ;;  %s482_s29 = scalar_lea.vmem %s1611_s4, %s481_s19  ;;  %s942_s12 = scalar_lea.vmem (%p1480_p6), %s1612_s5, %s1204_s9 }
  0x30   : > { %1284 = vmatprep.subr.bf16.mxu0 %v1403_v31  ;;  %1283 = vmatpush3.bf16.msra.mxu1 %v1282_v41  ;;  %v506_v3 = vadd.f32 %v505_v58, %v499_v49  ;;  %v730_v10 = vmul.f32 %v720_v8, %v720_v8  ;;  %v1285_v28 = vpack.c.bf16 %v714_v51, %v713_v50 }
  0x31   : > { %1290 = vmatprep.subr.bf16.mxu1 %v1403_v31  ;;  %v515_v5 = vadd.f32 %v514_v63, %v503_v53  ;;  %v732_v6 = vadd.f32 %v731_v0, %v725_v59  ;;  %v740_v7 = vadd.f32 %v728_v2, %v727_v1  ;;  %v1288_v34 = vpack.c.bf16 %v716_v57, %v715_v56 }
  0x32   : > { %v1291_v35 = vpack.c.bf16 %v718_v62, %v717_v61  ;;  %v1294_v38 = vpack.c.bf16 %v720_v8, %v719_v4  ;;  %v704_v0 = vlaneseq  ;;  %v485_v4 = vld [vmem:[%s482_s29] sm:$0x1] }
  0x33   : > { %v733_v11 = vadd.f32 %v732_v6, %v726_v60  ;;  %v741_v12 = vadd.f32 %v740_v7, %v729_v9 }
  0x34   : > { %v705_v2 = vshrl.u32 %v704_v0, 7 }
  0x35   : > { %v742_v13 = vadd.f32 %v741_v12, %v730_v10  ;;  %v734_v41 = vrot.slane %v733_v11, 4 }
  0x36   : > { %v706_v9 = vsub.s32 0, %v705_v2 }
  0x37   : > { %v735_v43 = vadd.f32 %v734_v41, %v733_v11  ;;  %v743_v44 = vrot.slane %v742_v13, 4 }
  0x39   : > { %v736_v47 = vrot.slane %v735_v43, 2 }
  0xb6   : > { %v531_v14 = vpop.xlane.xlu0 %530 }
  0xb7   : > { %v757_v15 = vpop.xlane.xlu1 %756  ;;  %v535_v19 = vmax.f32 %v531_v14, 1e-24 }
  0xb8   : > { %v761_v23 = vmax.f32 %v757_v15, 1e-24 }
  0xb9   : > { %1339 = vrsqrt.f32 %v535_v19 }
  0xba   : > { %v534_v20 = vpop.xlane.xlu0 %533 }
  0xbb   : > { %v536_v21 = vmax.f32 %v534_v20, 1e-24  ;;  %v760_v24 = vpop.xlane.xlu1 %759 }
  0xbc   : > { %v762_v25 = vmax.f32 %v760_v24, 1e-24 }
  0xbd   : > { %1341 = vrsqrt.f32 %v536_v21 }
  0xbe   : > { %1343 = vrsqrt.f32 %v761_v23 }
  0xbf   : > { %1345 = vrsqrt.f32 %v762_v25 }
  0xc3   : > { %v1340_v26 = vpop.eup %1339 }
  0xc4   : > { %v539_v27 = vmul.f32 10.0, %v1340_v26 }
  0xc6   : > { %v541_v29 = vmul.f32 %v539_v27, %v1507_v16 }
  0xc7   : > { %v1342_v30 = vpop.eup %1341 }
  0xc8   : > { %v540_v32 = vmul.f32 10.0, %v1342_v30  ;;  %1237 = vmatmul.mubr.msk.f32.vlgmr.msra.gmra.mrb[0].mxu0 %vm528_vm0, %v541_v29  ;;  %v1344_v33 = vpop.eup %1343 }
  0xc9   : > { %1286 = vmatpush3.bf16.msra.mxu0 %v1285_v28  ;;  %1258 = vmatprep.mubr.msk.f32.mxu0 %vm1404_vm1, %v1405_v40  ;;  %v765_v37 = vmul.f32 %v1344_v33, %v1517_v18  ;;  %v1346_v16 = vpop.eup %1345  ;;  %v516_v18 = vrot.slane %v515_v5, 4 }
  0xca   : > { %v542_v36 = vmul.f32 %v540_v32, %v1512_v17  ;;  %1287 = vmatprep.subr.bf16.mxu0 %v1403_v31  ;;  %v766_v39 = vmul.f32 %v1346_v16, %v1528_v22  ;;  %v507_v17 = vrot.slane %v506_v3, 4 }
  0xcb   : > { %v517_v46 = vadd.f32 %v516_v18, %v515_v5 }
  0xcc   : > { %1248 = vmatmul.mubr.msk.f32.vlgmr.msra.gmra.mrb[0].mxu1 %vm528_vm0, %v542_v36  ;;  %v508_v42 = vadd.f32 %v507_v17, %v506_v3 }
  0xcd   : > { %1289 = vmatpush3.bf16.msra.mxu0 %v1288_v34  ;;  %1292 = vmatpush3.bf16.msra.mxu1 %v1291_v35  ;;  %v518_v49 = vrot.slane %v517_v46, 2  ;;  %v707_v35 = vrot.slane %v485_v4, %v706_v9 }
  0xce   : > { %1293 = vmatprep.subr.bf16.mxu1 %v1403_v31  ;;  %1269 = vmatprep.mubr.msk.f32.mxu1 %vm1404_vm1, %v1405_v40  ;;  %v509_v45 = vrot.slane %v508_v42, 2  ;;  %v744_v31 = vadd.f32 %v743_v44, %v742_v13  ;;  %v737_v40 = vadd.f32 %v736_v47, %v735_v43 }
  0xcf   : > { %v519_v51 = vadd.f32 %v518_v49, %v517_v46 }
  0xd0   : > { %1259 = vmatmul.mubr.msk.f32.vlgmr.msra.gmra.mrb[2].mxu0 %vm528_vm0, %v765_v37  ;;  %v510_v48 = vadd.f32 %v509_v45, %v508_v42  ;;  %v745_v22 = vrot.slane %v744_v31, 2  ;;  %v738_v52 = vrot.slane %v737_v40, 1 }
  0xd1   : > { %1295 = vmatpush3.bf16.msra.mxu1 %v1294_v38  ;;  %v520_v54 = vrot.slane %v519_v51, 1 }
  0xd2   : > { %v511_v50 = vrot.slane %v510_v48, 1  ;;  %v746_v53 = vadd.f32 %v745_v22, %v744_v31  ;;  %v739_v57 = vadd.f32 %v738_v52, %v737_v40 }
  0xd3   : > { %v521_v59 = vadd.f32 %v520_v54, %v519_v51 }
  0xd4   : > { %1270 = vmatmul.mubr.msk.f32.vlgmr.msra.gmra.mrb[2].mxu1 %vm528_vm0, %v766_v39  ;;  %v512_v55 = vadd.f32 %v511_v50, %v510_v48  ;;  %v747_v56 = vrot.slane %v746_v53, 1  ;;  %v749_v60 = vmax.f32 %v739_v57, 1e-24 }
  0xd5   : > { %v523_v62 = vmax.f32 %v521_v59, 1e-24 }
  0xd6   : > { %v522_v58 = vmax.f32 %v512_v55, 1e-24  ;;  %v748_v61 = vadd.f32 %v747_v56, %v746_v53 }
  0xd8   : > { %1347 = vrsqrt.f32 %v522_v58  ;;  %v750_v63 = vmax.f32 %v748_v61, 1e-24 }
  0xd9   : > { %1349 = vrsqrt.f32 %v749_v60 }
  0xda   : > { %1351 = vrsqrt.f32 %v523_v62 }
  0xdb   : > { %1353 = vrsqrt.f32 %v750_v63 }
  0xe2   : > { %v1348_v1 = vpop.eup %1347 }
  0xe3   : > { %v1350_v3 = vpop.eup %1349 }
  0xe4   : > { %v1352_v6 = vpop.eup %1351  ;;  %v913_v10 = vmul.f32 %v1350_v3, %v485_v4 }
  0xe5   : > { %v1354_v11 = vpop.eup %1353 }
  0xe6   : > { %v918_v19 = vrot.slane %v913_v10, %v706_v9  ;;  %v914_v20 = vmul.f32 %v1354_v11, %v485_v4 }
  0xe8   : > { %v922_v26 = vrot.slane %v914_v20, %v706_v9 }
 0x19b   : > { %v612_v5 = vpop.f32.mrb[0].mxu0 }
 0x19c   : > { %v689_v7 = vmul.f32 %v1348_v1, %v612_v5  ;;  %v1238_v8 = vpop.f32.mrb[1].mxu0 }
 0x19e   : > { %v1198_v12 = vmul.f32 -1.442695, %v689_v7 }
 0x19f   : > { %v685_v13 = vpop.f32.mrb[0].mxu1 }
 0x1a0   : > { %1355 = vpow2.f32 %v1198_v12  ;;  %v690_v14 = vmul.f32 %v1352_v6, %v685_v13  ;;  %v1249_v15 = vpop.f32.mrb[1].mxu1 }
 0x1a2   : > { %v1199_v21 = vmul.f32 -1.442695, %v690_v14 }
 0x1a3   : > { %v836_v23 = vpop.f32.mrb[2].mxu0 }
 0x1a4   : > { %1357 = vpow2.f32 %v1199_v21  ;;  %v923_v24 = vmul.f32 %v918_v19, %v836_v23  ;;  %v1260_v25 = vpop.f32.mrb[3].mxu0 }
 0x1a6   : > { %925 = vst [vmem:[%s1574_s30] sm:$0xff] %v923_v24 }
 0x1a7   : > { %v909_v27 = vpop.f32.mrb[2].mxu1 }
 0x1a8   : > { %v924_v28 = vmul.f32 %v922_v26, %v909_v27  ;;  %v1271_v29 = vpop.f32.mrb[3].mxu1 }
 0x1aa   : > { %v1356_v30 = vpop.eup %1355  ;;  %926 = vst [vmem:[%s1574_s30 + $0x8] sm:$0xff] %v924_v28 }
 0x1ab   : > { %v697_v32 = vadd.f32 1.0, %v1356_v30 }
 0x1ad   : > { %1359 = vrcp.f32 %v697_v32 }
 0x1ae   : > { %v1358_v33 = vpop.eup %1357 }
 0x1af   : > { %v698_v34 = vadd.f32 1.0, %v1358_v33 }
 0x1b1   : > { %1361 = vrcp.f32 %v698_v34 }
 0x1b7   : > { %v1360_v36 = vpop.eup %1359 }
 0x1b8   : > { %v709_v37 = vmul.f32 %v1360_v36, %v707_v35  ;;  %937 = sbr.rel (!%p1480_p6) target bundleno = 455 (0x1c7), region = 120 }
 0x1ba   : > { %711 = vst [vmem:[%s459_s21] sm:$0xff] %v709_v37 }
 0x1bb   : > { %v1362_v16 = vpop.eup %1361 }
 0x1bc   : > { %v710_v38 = vmul.f32 %v1362_v16, %v707_v35 }
 0x1be   : > { %712 = vst [vmem:[%s459_s21 + $0x8] sm:$0xff] %v710_v38 }
 0x1c1   : > { %v972_v39 = vld [vmem:[%s459_s21] sm:$0xff] }
 0x1c2   : > { %973 = vst [vmem:[%s942_s12] sm:$0xff] %v972_v39 }
 0x1c5   : > { %v974_v17 = vld [vmem:[%s459_s21 + $0x8] sm:$0xff] }
 0x1c6   : > { %975 = vst [vmem:[%s942_s12 + $0x10] sm:$0xff] %v974_v17 }
 0x1c7 PF: > { %981 = sbr.rel (!%p1480_p6) target bundleno = 462 (0x1ce), region = 158  ;;  %s1205_s13 = sshll.u32 (%p1480_p6), %s1393_s23, 3  ;;  %v1016_v41 = vld [vmem:[%s1574_s30] sm:$0xff] (%p1480_p6)  ;;  %v1018_v42 = vld [vmem:[%s1574_s30 + $0x8] sm:$0xff] (%p1480_p6) }
 0x1c8   : > { %s986_s16 = scalar_lea.vmem (%p1480_p6), %s1613_s6, %s1205_s13 }
 0x1c9   : > { %1017 = vst [vmem:[%s986_s16] sm:$0xff] (%p1480_p6), %v1016_v41  ;;  %1019 = vst [vmem:[%s986_s16 + $0x10] sm:$0xff] (%p1480_p6), %v1018_v42 }
 0x1ce PF: > { %s17_s25 = sadd.s32 1, %s1401_s25   ;;  %s1616_s21 = smov %s1389_s22 }
 0x1cf   : > { %p14_p12 = scmp.ge.s32.totalorder %s17_s25, 4   ;;  %s1617_s22 = smov %s1485_s8 }
 0x1d0   : > { %s1618_s23 = smov %s1397_s24  ;;  %s1619_s24 = smov %s1621_s26 }
 0x1d1   :  { %16 = sbr.rel (!%p14_p12) target bundleno = 3 (0x3), region = 256 }

</bundles_post_ra>
